<compile_context>
chip_gen: v7x
topology: tpu7x:2x2x1
jax: 0.10.0
libtpu: 0.0.40
codegen_flags: <defaults>
</compile_context>

<pallas_src>
import functools

import jax
import jax.numpy as jnp
from jax import lax
from jax.experimental import pallas as pl
from jax.experimental.pallas import tpu as pltpu


def _round_up(x, m):
    return (x + m - 1) // m * m


def _lane_tile(lw, cap=2048):
    """Largest 128-multiple divisor of lw that is <= cap (lw is a 128-multiple)."""
    if lw <= cap:
        return lw
    for cand in (2048, 1024, 512, 256, 128):
        if lw % cand == 0:
            return cand
    return lw


_VMEM_LIMIT = 32 * 1024 * 1024  # scoped-VMEM budget valid on v5e/v6e/v7x


# ---------------------------------------------------------------------------
# Kernel 1a: direct conv (stride == 1) + per-image BN partial statistics.
# Builds the patches in-kernel from the flat padded image (no HBM im2col).
# ---------------------------------------------------------------------------
def _make_direct_conv_kernel(k, dilation, w_pad, l_wide, c_out):
    def kernel(x_ref, w_ref, mask_ref, y_ref, sum_ref, sq_ref):
        # x_ref:    [1, C_in, L_flat]    bf16 flattened zero-padded image
        # w_ref:    [kH*kW, C_out, C_in] bf16
        # mask_ref: [L_wide, 1] f32 (1.0 on valid output columns, else 0.0)
        # y_ref:    [1, C_out, L_wide]   bf16 (lane-dense wide conv output)
        # sum_ref/sq_ref: [1, C_out, 1]  f32 per-image partial statistics
        acc = jnp.zeros((c_out, l_wide), jnp.float32)
        for kh in range(k):
            for kw in range(k):
                off = (kh * w_pad + kw) * dilation                # static offset
                win = x_ref[0, :, off:off + l_wide]               # [C_in, L_wide]
                acc = acc + jnp.dot(w_ref[kh * k + kw], win,
                                    preferred_element_type=jnp.float32)
        y_ref[0] = acc.astype(y_ref.dtype)
        mask = mask_ref[...]                                      # [L_wide, 1]
        # Masked sum / sumsq as MXU matmuls (garbage columns zeroed by the mask).
        sum_ref[0] = jnp.dot(acc, mask, preferred_element_type=jnp.float32)
        sq_ref[0] = jnp.dot(acc * acc, mask, preferred_element_type=jnp.float32)

    return kernel


# ---------------------------------------------------------------------------
# Kernel 1b: transposed lane-dense im2col GEMM (fallback for stride > 1).
# ---------------------------------------------------------------------------
def _gemm_stats_kernel(x_ref, w_ref, y_ref, sum_ref, sq_ref):
    # x_ref: [1, K, TP] bf16 (X_col^T tile, padded columns are zero)
    # w_ref: [C_out, K] bf16
    y = jnp.dot(w_ref[...], x_ref[0], preferred_element_type=jnp.float32)
    y_ref[0] = y.astype(y_ref.dtype)
    sum_ref[0] = jnp.sum(y, axis=-1, keepdims=True)       # full-width lane reduce
    sq_ref[0] = jnp.sum(y * y, axis=-1, keepdims=True)


# ---------------------------------------------------------------------------
# Kernel 2: folded BatchNorm + ReLU on lane-dense [C_out, TL] tiles.
# ---------------------------------------------------------------------------
def _bn_relu_kernel(y_ref, scale_ref, shift_ref, o_ref):
    y = y_ref[0].astype(jnp.float32)                       # [C_out, TL]
    o_ref[0] = jnp.maximum(y * scale_ref[...] + shift_ref[...], 0.0)


# ---------------------------------------------------------------------------
# Host-side wrappers around the pallas_calls
# ---------------------------------------------------------------------------
def _conv_stats_direct(xb, wb, k, padding, dilation, ho, wo):
    """stride==1 path. Returns (y_wide [N,C_out,Lw] bf16, csum [C_out], csq [C_out])."""
    n, c_in, h, w = xb.shape
    c_out = wb.shape[0]
    hp, wp = h + 2 * padding, w + 2 * padding
    lw = _round_up(ho * wp, 128)                           # lane-dense wide width
    max_off = (k - 1) * dilation * (wp + 1)
    lflat = max_off + lw

    x_pad = jnp.pad(xb, ((0, 0), (0, 0), (padding, padding), (padding, padding)))
    x_flat = x_pad.reshape(n, c_in, hp * wp)
    x_flat = jnp.pad(x_flat, ((0, 0), (0, 0), (0, lflat - hp * wp)))

    # weight as [kH*kW, C_out, C_in]
    w_r = wb.transpose(2, 3, 0, 1).reshape(k * k, c_out, c_in)

    # validity mask over the wide layout (excludes wrapped + lane-padding columns)
    col = jnp.arange(lw)
    mask = ((col < ho * wp) & ((col % wp) < wo)).astype(jnp.float32).reshape(lw, 1)

    kernel = _make_direct_conv_kernel(k, dilation, wp, lw, c_out)
    y, psum, psq = pl.pallas_call(
        kernel,
        out_shape=(
            jax.ShapeDtypeStruct((n, c_out, lw), jnp.bfloat16),
            jax.ShapeDtypeStruct((n, c_out, 1), jnp.float32),
            jax.ShapeDtypeStruct((n, c_out, 1), jnp.float32),
        ),
        grid_spec=pltpu.PrefetchScalarGridSpec(
            num_scalar_prefetch=0,
            grid=(n,),
            in_specs=[
                pl.BlockSpec((1, c_in, lflat), lambda i: (i, 0, 0)),
                pl.BlockSpec((k * k, c_out, c_in), lambda i: (0, 0, 0)),
                pl.BlockSpec((lw, 1), lambda i: (0, 0)),
            ],
            out_specs=[
                pl.BlockSpec((1, c_out, lw), lambda i: (i, 0, 0)),
                pl.BlockSpec((1, c_out, 1), lambda i: (i, 0, 0)),
                pl.BlockSpec((1, c_out, 1), lambda i: (i, 0, 0)),
            ],
        ),
        compiler_params=pltpu.CompilerParams(
            dimension_semantics=("parallel",),
            vmem_limit_bytes=_VMEM_LIMIT,
        ),
    )(x_flat, w_r, mask)

    csum = psum.sum(axis=0)[:, 0]
    csq = psq.sum(axis=0)[:, 0]
    return y, csum, csq


def _conv_stats_gemm(xb, wb, k, stride, padding, dilation, ho, wo):
    """stride>1 fallback: transposed lane-dense im2col GEMM."""
    n, c_in, h, w = xb.shape
    c_out = wb.shape[0]
    x_pad = jnp.pad(xb, ((0, 0), (0, 0), (padding, padding), (padding, padding)))

    cols = []
    for kh in range(k):
        for kw in range(k):
            sl = lax.slice(
                x_pad,
                (0, 0, kh * dilation, kw * dilation),
                (n, c_in,
                 kh * dilation + stride * (ho - 1) + 1,
                 kw * dilation + stride * (wo - 1) + 1),
                (1, 1, stride, stride))                     # [N, C_in, Ho, Wo]
            cols.append(sl.reshape(n, c_in, ho * wo))
    xcol_t = jnp.concatenate(cols, axis=1)                  # [N, K, Ho*Wo], K=(kh,kw,ci)
    kdim = k * k * c_in
    pp = _round_up(ho * wo, 128)
    xcol_t = jnp.pad(xcol_t, ((0, 0), (0, 0), (0, pp - ho * wo)))
    w_col_t = wb.transpose(0, 2, 3, 1).reshape(c_out, kdim)  # matching K order

    tp = _lane_tile(pp)
    grid_p = pp // tp

    y, psum, psq = pl.pallas_call(
        _gemm_stats_kernel,
        out_shape=(
            jax.ShapeDtypeStruct((n, c_out, pp), jnp.bfloat16),
            jax.ShapeDtypeStruct((n * grid_p, c_out, 1), jnp.float32),
            jax.ShapeDtypeStruct((n * grid_p, c_out, 1), jnp.float32),
        ),
        grid_spec=pltpu.PrefetchScalarGridSpec(
            num_scalar_prefetch=0,
            grid=(n, grid_p),
            in_specs=[
                pl.BlockSpec((1, kdim, tp), lambda i, j: (i, 0, j)),
                pl.BlockSpec((c_out, kdim), lambda i, j: (0, 0)),
            ],
            out_specs=[
                pl.BlockSpec((1, c_out, tp), lambda i, j: (i, 0, j)),
                pl.BlockSpec((1, c_out, 1), lambda i, j: (i * grid_p + j, 0, 0)),
                pl.BlockSpec((1, c_out, 1), lambda i, j: (i * grid_p + j, 0, 0)),
            ],
        ),
        compiler_params=pltpu.CompilerParams(
            dimension_semantics=("parallel", "parallel"),
            vmem_limit_bytes=_VMEM_LIMIT,
        ),
    )(xcol_t, w_col_t)

    csum = psum.sum(axis=0)[:, 0]
    csq = psq.sum(axis=0)[:, 0]
    return y, csum, csq


def _bn_relu(y_wide, scale, shift):
    n, c_out, lw = y_wide.shape
    tl = _lane_tile(lw)                                     # lane-tile (VMEM safe)
    grid_l = lw // tl
    return pl.pallas_call(
        _bn_relu_kernel,
        out_shape=jax.ShapeDtypeStruct((n, c_out, lw), jnp.float32),
        grid_spec=pltpu.PrefetchScalarGridSpec(
            num_scalar_prefetch=0,
            grid=(n, grid_l),
            in_specs=[
                pl.BlockSpec((1, c_out, tl), lambda i, j: (i, 0, j)),
                pl.BlockSpec((c_out, 1), lambda i, j: (0, 0)),
                pl.BlockSpec((c_out, 1), lambda i, j: (0, 0)),
            ],
            out_specs=pl.BlockSpec((1, c_out, tl), lambda i, j: (i, 0, j)),
        ),
        compiler_params=pltpu.CompilerParams(
            dimension_semantics=("parallel", "parallel"),
            vmem_limit_bytes=_VMEM_LIMIT,
        ),
    )(y_wide, scale, shift)


@functools.partial(jax.jit,
                   static_argnames=("kernel_size", "stride", "padding", "dilation"))
def basic_conv2d(x, weight, gamma, beta, *, kernel_size, stride=1, padding=0,
                 dilation=1, eps=1e-5):
    """BasicConv2d forward. x: [N, C_in, H, W] NCHW, weight: [C_out, C_in, kH, kW]."""
    n, c_in, h, w = x.shape
    c_out = weight.shape[0]
    k = kernel_size
    ho = (h + 2 * padding - dilation * (k - 1) - 1) // stride + 1
    wo = (w + 2 * padding - dilation * (k - 1) - 1) // stride + 1

    xb = x.astype(jnp.bfloat16)
    wb = weight.astype(jnp.bfloat16)

    if stride == 1:
        y_wide, csum, csq = _conv_stats_direct(xb, wb, k, padding, dilation, ho, wo)
    else:
        y_wide, csum, csq = _conv_stats_gemm(xb, wb, k, stride, padding, dilation, ho, wo)

    # BatchNorm train-mode batch statistics (biased variance, as in PyTorch).
    # NOTE: E[y^2]-E[y]^2 in f32; consider compensated sums for activations with
    # |mean| >> std.
    m_count = n * ho * wo
    mean = csum / m_count
    var = csq / m_count - mean * mean
    scale = (gamma.astype(jnp.float32) / jnp.sqrt(var + eps)).reshape(c_out, 1)
    shift = beta.astype(jnp.float32).reshape(c_out, 1) - mean.reshape(c_out, 1) * scale

    out_wide = _bn_relu(y_wide, scale, shift)               # [N, C_out, Lw] f32

    # Output is already [N, C_out, spatial]: only a cheap slice/reshape remains.
    if stride == 1:
        wp = w + 2 * padding
        out = out_wide[:, :, :ho * wp].reshape(n, c_out, ho, wp)[:, :, :, :wo]
    else:
        out = out_wide[:, :, :ho * wo].reshape(n, c_out, ho, wo)
    return out


# ---------------------------------------------------------------------------
# Pure-JAX reference (for verification only)
# ---------------------------------------------------------------------------
def _reference(x, weight, gamma, beta, *, stride, padding, dilation, eps=1e-5):
    y = lax.conv_general_dilated(
        x.astype(jnp.float32), weight.astype(jnp.float32),
        window_strides=(stride, stride),
        padding=[(padding, padding), (padding, padding)],
        rhs_dilation=(dilation, dilation),
        dimension_numbers=("NCHW", "OIHW", "NCHW"),
    )
    mean = y.mean(axis=(0, 2, 3), keepdims=True)
    var = ((y - mean) ** 2).mean(axis=(0, 2, 3), keepdims=True)  # biased (BN train)
    yn = (y - mean) / jnp.sqrt(var + eps) * gamma.reshape(1, -1, 1, 1) + beta.reshape(1, -1, 1, 1)
    return jnp.maximum(yn, 0.0)


if __name__ == "__main__":
    # Module config: BasicConv2d(in_planes=4, out_planes=8, kernel_size=3, padding=1)
    N, C_IN, H, W = 2, 4, 16, 16
    C_OUT, K, STRIDE, PAD, DIL = 8, 3, 1, 1, 1

    key = jax.random.PRNGKey(0)
    kx, kw = jax.random.split(key)
    x = jax.random.normal(kx, (N, C_IN, H, W), dtype=jnp.float32)
    fan_in = C_IN * K * K
    weight = jax.random.uniform(kw, (C_OUT, C_IN, K, K), jnp.float32,
                                minval=-1.0, maxval=1.0) / jnp.sqrt(fan_in)
    gamma = jnp.ones((C_OUT,), jnp.float32)
    beta = jnp.zeros((C_OUT,), jnp.float32)

    out = basic_conv2d(x, weight, gamma, beta,
                       kernel_size=K, stride=STRIDE, padding=PAD, dilation=DIL)
    out = jax.block_until_ready(out)

    ref = _reference(x, weight, gamma, beta, stride=STRIDE, padding=PAD, dilation=DIL)
    assert out.shape == ref.shape == (N, C_OUT, H, W)
    max_err = float(jnp.max(jnp.abs(out - ref)))
    assert jnp.allclose(out, ref, rtol=2e-2, atol=3e-2), max_err  # bf16 operands

    print("KERNEL_OK")
</pallas_src>

<mosaic_0001>
module attributes {stable_mosaic.version = 11 : i64} {
  func.func @kernel(%arg0: i32, %arg1: memref<1x4x422xbf16, #tpu.memory_space<vmem>>, %arg2: memref<9x8x4xbf16, #tpu.memory_space<vmem>>, %arg3: memref<384x1xf32, #tpu.memory_space<vmem>>, %arg4: memref<1x8x384xbf16, #tpu.memory_space<vmem>>, %arg5: memref<1x8x1xf32, #tpu.memory_space<vmem>>, %arg6: memref<1x8x1xf32, #tpu.memory_space<vmem>>) attributes {dimension_semantics = [#tpu.dimension_semantics<parallel>], iteration_bounds = array<i64: 2>, scalar_prefetch = 0 : i64, scratch_operands = 0 : i64, tpu.core_type = #tpu.core_type<tc>, window_params = [{transform_indices = @transform_0, window_bounds = array<i64: 1, 4, 422>}, {pipeline_mode = #tpu.pipeline_mode<synchronous>, transform_indices = @transform_1, window_bounds = array<i64: 9, 8, 4>}, {pipeline_mode = #tpu.pipeline_mode<synchronous>, transform_indices = @transform_2, window_bounds = array<i64: 384, 1>}, {transform_indices = @transform_3, window_bounds = array<i64: 1, 8, 384>}, {transform_indices = @transform_4, window_bounds = array<i64: 1, 8, 1>}, {transform_indices = @transform_5, window_bounds = array<i64: 1, 8, 1>}]} {
    %cst = arith.constant 0.000000e+00 : f32
    %0 = vector.broadcast %cst : f32 to vector<8x384xf32>
    %c0 = arith.constant 0 : index
    %c0_0 = arith.constant 0 : index
    %c0_1 = arith.constant 0 : index
    %1 = vector.load %arg1[%c0, %c0_0, %c0_1] : memref<1x4x422xbf16, #tpu.memory_space<vmem>>, vector<1x4x384xbf16>
    %2 = vector.shape_cast %1 : vector<1x4x384xbf16> to vector<4x384xbf16>
    %c0_2 = arith.constant 0 : index
    %c0_3 = arith.constant 0 : index
    %c0_4 = arith.constant 0 : index
    %3 = vector.load %arg2[%c0_2, %c0_3, %c0_4] : memref<9x8x4xbf16, #tpu.memory_space<vmem>>, vector<1x8x4xbf16>
    %4 = vector.shape_cast %3 : vector<1x8x4xbf16> to vector<8x4xbf16>
    %cst_5 = arith.constant dense<0.000000e+00> : vector<8x384xf32>
    %5 = tpu.matmul %4, %2, %cst_5 {dimension_numbers = #tpu.dot_dimension_numbers<[1], [0], [0], [1], [0, 0, 1, 1], [], []>} : vector<8x4xbf16>, vector<4x384xbf16>, vector<8x384xf32> -> vector<8x384xf32>
    %6 = arith.addf %0, %5 : vector<8x384xf32>
    %c0_6 = arith.constant 0 : index
    %c0_7 = arith.constant 0 : index
    %c1 = arith.constant 1 : index
    %7 = vector.load %arg1[%c0_6, %c0_7, %c1] : memref<1x4x422xbf16, #tpu.memory_space<vmem>>, vector<1x4x384xbf16>
    %8 = vector.shape_cast %7 : vector<1x4x384xbf16> to vector<4x384xbf16>
    %c1_8 = arith.constant 1 : index
    %c0_9 = arith.constant 0 : index
    %c0_10 = arith.constant 0 : index
    %9 = vector.load %arg2[%c1_8, %c0_9, %c0_10] : memref<9x8x4xbf16, #tpu.memory_space<vmem>>, vector<1x8x4xbf16>
    %10 = vector.shape_cast %9 : vector<1x8x4xbf16> to vector<8x4xbf16>
    %cst_11 = arith.constant dense<0.000000e+00> : vector<8x384xf32>
    %11 = tpu.matmul %10, %8, %cst_11 {dimension_numbers = #tpu.dot_dimension_numbers<[1], [0], [0], [1], [0, 0, 1, 1], [], []>} : vector<8x4xbf16>, vector<4x384xbf16>, vector<8x384xf32> -> vector<8x384xf32>
    %12 = arith.addf %6, %11 : vector<8x384xf32>
    %c0_12 = arith.constant 0 : index
    %c0_13 = arith.constant 0 : index
    %c2 = arith.constant 2 : index
    %13 = vector.load %arg1[%c0_12, %c0_13, %c2] : memref<1x4x422xbf16, #tpu.memory_space<vmem>>, vector<1x4x384xbf16>
    %14 = vector.shape_cast %13 : vector<1x4x384xbf16> to vector<4x384xbf16>
    %c2_14 = arith.constant 2 : index
    %c0_15 = arith.constant 0 : index
    %c0_16 = arith.constant 0 : index
    %15 = vector.load %arg2[%c2_14, %c0_15, %c0_16] : memref<9x8x4xbf16, #tpu.memory_space<vmem>>, vector<1x8x4xbf16>
    %16 = vector.shape_cast %15 : vector<1x8x4xbf16> to vector<8x4xbf16>
    %cst_17 = arith.constant dense<0.000000e+00> : vector<8x384xf32>
    %17 = tpu.matmul %16, %14, %cst_17 {dimension_numbers = #tpu.dot_dimension_numbers<[1], [0], [0], [1], [0, 0, 1, 1], [], []>} : vector<8x4xbf16>, vector<4x384xbf16>, vector<8x384xf32> -> vector<8x384xf32>
    %18 = arith.addf %12, %17 : vector<8x384xf32>
    %c0_18 = arith.constant 0 : index
    %c0_19 = arith.constant 0 : index
    %c18 = arith.constant 18 : index
    %19 = vector.load %arg1[%c0_18, %c0_19, %c18] : memref<1x4x422xbf16, #tpu.memory_space<vmem>>, vector<1x4x384xbf16>
    %20 = vector.shape_cast %19 : vector<1x4x384xbf16> to vector<4x384xbf16>
    %c3 = arith.constant 3 : index
    %c0_20 = arith.constant 0 : index
    %c0_21 = arith.constant 0 : index
    %21 = vector.load %arg2[%c3, %c0_20, %c0_21] : memref<9x8x4xbf16, #tpu.memory_space<vmem>>, vector<1x8x4xbf16>
    %22 = vector.shape_cast %21 : vector<1x8x4xbf16> to vector<8x4xbf16>
    %cst_22 = arith.constant dense<0.000000e+00> : vector<8x384xf32>
    %23 = tpu.matmul %22, %20, %cst_22 {dimension_numbers = #tpu.dot_dimension_numbers<[1], [0], [0], [1], [0, 0, 1, 1], [], []>} : vector<8x4xbf16>, vector<4x384xbf16>, vector<8x384xf32> -> vector<8x384xf32>
    %24 = arith.addf %18, %23 : vector<8x384xf32>
    %c0_23 = arith.constant 0 : index
    %c0_24 = arith.constant 0 : index
    %c19 = arith.constant 19 : index
    %25 = vector.load %arg1[%c0_23, %c0_24, %c19] : memref<1x4x422xbf16, #tpu.memory_space<vmem>>, vector<1x4x384xbf16>
    %26 = vector.shape_cast %25 : vector<1x4x384xbf16> to vector<4x384xbf16>
    %c4 = arith.constant 4 : index
    %c0_25 = arith.constant 0 : index
    %c0_26 = arith.constant 0 : index
    %27 = vector.load %arg2[%c4, %c0_25, %c0_26] : memref<9x8x4xbf16, #tpu.memory_space<vmem>>, vector<1x8x4xbf16>
    %28 = vector.shape_cast %27 : vector<1x8x4xbf16> to vector<8x4xbf16>
    %cst_27 = arith.constant dense<0.000000e+00> : vector<8x384xf32>
    %29 = tpu.matmul %28, %26, %cst_27 {dimension_numbers = #tpu.dot_dimension_numbers<[1], [0], [0], [1], [0, 0, 1, 1], [], []>} : vector<8x4xbf16>, vector<4x384xbf16>, vector<8x384xf32> -> vector<8x384xf32>
    %30 = arith.addf %24, %29 : vector<8x384xf32>
    %c0_28 = arith.constant 0 : index
    %c0_29 = arith.constant 0 : index
    %c20 = arith.constant 20 : index
    %31 = vector.load %arg1[%c0_28, %c0_29, %c20] : memref<1x4x422xbf16, #tpu.memory_space<vmem>>, vector<1x4x384xbf16>
    %32 = vector.shape_cast %31 : vector<1x4x384xbf16> to vector<4x384xbf16>
    %c5 = arith.constant 5 : index
    %c0_30 = arith.constant 0 : index
    %c0_31 = arith.constant 0 : index
    %33 = vector.load %arg2[%c5, %c0_30, %c0_31] : memref<9x8x4xbf16, #tpu.memory_space<vmem>>, vector<1x8x4xbf16>
    %34 = vector.shape_cast %33 : vector<1x8x4xbf16> to vector<8x4xbf16>
    %cst_32 = arith.constant dense<0.000000e+00> : vector<8x384xf32>
    %35 = tpu.matmul %34, %32, %cst_32 {dimension_numbers = #tpu.dot_dimension_numbers<[1], [0], [0], [1], [0, 0, 1, 1], [], []>} : vector<8x4xbf16>, vector<4x384xbf16>, vector<8x384xf32> -> vector<8x384xf32>
    %36 = arith.addf %30, %35 : vector<8x384xf32>
    %c0_33 = arith.constant 0 : index
    %c0_34 = arith.constant 0 : index
    %c36 = arith.constant 36 : index
    %37 = vector.load %arg1[%c0_33, %c0_34, %c36] : memref<1x4x422xbf16, #tpu.memory_space<vmem>>, vector<1x4x384xbf16>
    %38 = vector.shape_cast %37 : vector<1x4x384xbf16> to vector<4x384xbf16>
    %c6 = arith.constant 6 : index
    %c0_35 = arith.constant 0 : index
    %c0_36 = arith.constant 0 : index
    %39 = vector.load %arg2[%c6, %c0_35, %c0_36] : memref<9x8x4xbf16, #tpu.memory_space<vmem>>, vector<1x8x4xbf16>
    %40 = vector.shape_cast %39 : vector<1x8x4xbf16> to vector<8x4xbf16>
    %cst_37 = arith.constant dense<0.000000e+00> : vector<8x384xf32>
    %41 = tpu.matmul %40, %38, %cst_37 {dimension_numbers = #tpu.dot_dimension_numbers<[1], [0], [0], [1], [0, 0, 1, 1], [], []>} : vector<8x4xbf16>, vector<4x384xbf16>, vector<8x384xf32> -> vector<8x384xf32>
    %42 = arith.addf %36, %41 : vector<8x384xf32>
    %c0_38 = arith.constant 0 : index
    %c0_39 = arith.constant 0 : index
    %c37 = arith.constant 37 : index
    %43 = vector.load %arg1[%c0_38, %c0_39, %c37] : memref<1x4x422xbf16, #tpu.memory_space<vmem>>, vector<1x4x384xbf16>
    %44 = vector.shape_cast %43 : vector<1x4x384xbf16> to vector<4x384xbf16>
    %c7 = arith.constant 7 : index
    %c0_40 = arith.constant 0 : index
    %c0_41 = arith.constant 0 : index
    %45 = vector.load %arg2[%c7, %c0_40, %c0_41] : memref<9x8x4xbf16, #tpu.memory_space<vmem>>, vector<1x8x4xbf16>
    %46 = vector.shape_cast %45 : vector<1x8x4xbf16> to vector<8x4xbf16>
    %cst_42 = arith.constant dense<0.000000e+00> : vector<8x384xf32>
    %47 = tpu.matmul %46, %44, %cst_42 {dimension_numbers = #tpu.dot_dimension_numbers<[1], [0], [0], [1], [0, 0, 1, 1], [], []>} : vector<8x4xbf16>, vector<4x384xbf16>, vector<8x384xf32> -> vector<8x384xf32>
    %48 = arith.addf %42, %47 : vector<8x384xf32>
    %c0_43 = arith.constant 0 : index
    %c0_44 = arith.constant 0 : index
    %c38 = arith.constant 38 : index
    %49 = vector.load %arg1[%c0_43, %c0_44, %c38] : memref<1x4x422xbf16, #tpu.memory_space<vmem>>, vector<1x4x384xbf16>
    %50 = vector.shape_cast %49 : vector<1x4x384xbf16> to vector<4x384xbf16>
    %c8 = arith.constant 8 : index
    %c0_45 = arith.constant 0 : index
    %c0_46 = arith.constant 0 : index
    %51 = vector.load %arg2[%c8, %c0_45, %c0_46] : memref<9x8x4xbf16, #tpu.memory_space<vmem>>, vector<1x8x4xbf16>
    %52 = vector.shape_cast %51 : vector<1x8x4xbf16> to vector<8x4xbf16>
    %cst_47 = arith.constant dense<0.000000e+00> : vector<8x384xf32>
    %53 = tpu.matmul %52, %50, %cst_47 {dimension_numbers = #tpu.dot_dimension_numbers<[1], [0], [0], [1], [0, 0, 1, 1], [], []>} : vector<8x4xbf16>, vector<4x384xbf16>, vector<8x384xf32> -> vector<8x384xf32>
    %54 = arith.addf %48, %53 : vector<8x384xf32>
    %55 = arith.truncf %54 : vector<8x384xf32> to vector<8x384xbf16>
    %c0_48 = arith.constant 0 : index
    %c0_49 = arith.constant 0 : index
    %c0_50 = arith.constant 0 : index
    %56 = vector.load %arg4[%c0_48, %c0_49, %c0_50] : memref<1x8x384xbf16, #tpu.memory_space<vmem>>, vector<1x8x384xbf16>
    %57 = vector.shape_cast %56 : vector<1x8x384xbf16> to vector<8x384xbf16>
    %58 = vector.shape_cast %55 : vector<8x384xbf16> to vector<1x8x384xbf16>
    tpu.vector_store %arg4[%c0_48, %c0_49, %c0_50], %58 {strides = array<i32>} : memref<1x8x384xbf16, #tpu.memory_space<vmem>>, vector<1x8x384xbf16>,
    %c0_51 = arith.constant 0 : index
    %c0_52 = arith.constant 0 : index
    %59 = vector.load %arg3[%c0_51, %c0_52] : memref<384x1xf32, #tpu.memory_space<vmem>>, vector<384x1xf32>
    %cst_53 = arith.constant dense<0.000000e+00> : vector<8x1xf32>
    %60 = tpu.matmul %54, %59, %cst_53 {dimension_numbers = #tpu.dot_dimension_numbers<[1], [0], [0], [1], [0, 0, 1, 1], [], []>} : vector<8x384xf32>, vector<384x1xf32>, vector<8x1xf32> -> vector<8x1xf32>
    %c0_54 = arith.constant 0 : index
    %c0_55 = arith.constant 0 : index
    %c0_56 = arith.constant 0 : index
    %61 = vector.load %arg5[%c0_54, %c0_55, %c0_56] : memref<1x8x1xf32, #tpu.memory_space<vmem>>, vector<1x8x1xf32>
    %62 = vector.shape_cast %61 : vector<1x8x1xf32> to vector<8x1xf32>
    %63 = vector.shape_cast %60 : vector<8x1xf32> to vector<1x8x1xf32>
    tpu.vector_store %arg5[%c0_54, %c0_55, %c0_56], %63 {strides = array<i32>} : memref<1x8x1xf32, #tpu.memory_space<vmem>>, vector<1x8x1xf32>,
    %64 = arith.mulf %54, %54 : vector<8x384xf32>
    %cst_57 = arith.constant dense<0.000000e+00> : vector<8x1xf32>
    %65 = tpu.matmul %64, %59, %cst_57 {dimension_numbers = #tpu.dot_dimension_numbers<[1], [0], [0], [1], [0, 0, 1, 1], [], []>} : vector<8x384xf32>, vector<384x1xf32>, vector<8x1xf32> -> vector<8x1xf32>
    %c0_58 = arith.constant 0 : index
    %c0_59 = arith.constant 0 : index
    %c0_60 = arith.constant 0 : index
    %66 = vector.load %arg6[%c0_58, %c0_59, %c0_60] : memref<1x8x1xf32, #tpu.memory_space<vmem>>, vector<1x8x1xf32>
    %67 = vector.shape_cast %66 : vector<1x8x1xf32> to vector<8x1xf32>
    %68 = vector.shape_cast %65 : vector<8x1xf32> to vector<1x8x1xf32>
    tpu.vector_store %arg6[%c0_58, %c0_59, %c0_60], %68 {strides = array<i32>} : memref<1x8x1xf32, #tpu.memory_space<vmem>>, vector<1x8x1xf32>,
    return
  }
  func.func @transform_0(%arg0: i32) -> (i32, i32, i32) {
    %c0_i32 = arith.constant 0 : i32
    %c0_i32_0 = arith.constant 0 : i32
    %c0_i32_1 = arith.constant 0 : i32
    return %arg0, %c0_i32, %c0_i32_0 : i32, i32, i32
  }
  func.func @transform_1(%arg0: i32) -> (i32, i32, i32) {
    %c0_i32 = arith.constant 0 : i32
    %c0_i32_0 = arith.constant 0 : i32
    %c0_i32_1 = arith.constant 0 : i32
    %c0_i32_2 = arith.constant 0 : i32
    return %c0_i32, %c0_i32_0, %c0_i32_1 : i32, i32, i32
  }
  func.func @transform_2(%arg0: i32) -> (i32, i32) {
    %c0_i32 = arith.constant 0 : i32
    %c0_i32_0 = arith.constant 0 : i32
    %c0_i32_1 = arith.constant 0 : i32
    return %c0_i32, %c0_i32_0 : i32, i32
  }
  func.func @transform_3(%arg0: i32) -> (i32, i32, i32) {
    %c0_i32 = arith.constant 0 : i32
    %c0_i32_0 = arith.constant 0 : i32
    %c0_i32_1 = arith.constant 0 : i32
    return %arg0, %c0_i32, %c0_i32_0 : i32, i32, i32
  }
  func.func @transform_4(%arg0: i32) -> (i32, i32, i32) {
    %c0_i32 = arith.constant 0 : i32
    %c0_i32_0 = arith.constant 0 : i32
    %c0_i32_1 = arith.constant 0 : i32
    return %arg0, %c0_i32, %c0_i32_0 : i32, i32, i32
  }
  func.func @transform_5(%arg0: i32) -> (i32, i32, i32) {
    %c0_i32 = arith.constant 0 : i32
    %c0_i32_0 = arith.constant 0 : i32
    %c0_i32_1 = arith.constant 0 : i32
    return %arg0, %c0_i32, %c0_i32_0 : i32, i32, i32
  }
}

module attributes {stable_mosaic.version = 11 : i64} {
  func.func @_bn_relu_kernel(%arg0: i32, %arg1: i32, %arg2: memref<1x8x384xbf16, #tpu.memory_space<vmem>>, %arg3: memref<8x1xf32, #tpu.memory_space<vmem>>, %arg4: memref<8x1xf32, #tpu.memory_space<vmem>>, %arg5: memref<1x8x384xf32, #tpu.memory_space<vmem>>) attributes {dimension_semantics = [#tpu.dimension_semantics<parallel>, #tpu.dimension_semantics<parallel>], iteration_bounds = array<i64: 2, 1>, scalar_prefetch = 0 : i64, scratch_operands = 0 : i64, tpu.core_type = #tpu.core_type<tc>, window_params = [{transform_indices = @transform_0, window_bounds = array<i64: 1, 8, 384>}, {pipeline_mode = #tpu.pipeline_mode<synchronous>, transform_indices = @transform_1, window_bounds = array<i64: 8, 1>}, {pipeline_mode = #tpu.pipeline_mode<synchronous>, transform_indices = @transform_2, window_bounds = array<i64: 8, 1>}, {transform_indices = @transform_3, window_bounds = array<i64: 1, 8, 384>}]} {
    %c0 = arith.constant 0 : index
    %c0_0 = arith.constant 0 : index
    %c0_1 = arith.constant 0 : index
    %0 = vector.load %arg2[%c0, %c0_0, %c0_1] : memref<1x8x384xbf16, #tpu.memory_space<vmem>>, vector<1x8x384xbf16>
    %1 = vector.shape_cast %0 : vector<1x8x384xbf16> to vector<8x384xbf16>
    %2 = arith.extf %1 : vector<8x384xbf16> to vector<8x384xf32>
    %c0_2 = arith.constant 0 : index
    %c0_3 = arith.constant 0 : index
    %3 = vector.load %arg3[%c0_2, %c0_3] : memref<8x1xf32, #tpu.memory_space<vmem>>, vector<8x1xf32>
    %4 = vector.broadcast %3 : vector<8x1xf32> to vector<8x384xf32>
    %5 = arith.mulf %2, %4 : vector<8x384xf32>
    %c0_4 = arith.constant 0 : index
    %c0_5 = arith.constant 0 : index
    %6 = vector.load %arg4[%c0_4, %c0_5] : memref<8x1xf32, #tpu.memory_space<vmem>>, vector<8x1xf32>
    %7 = vector.broadcast %6 : vector<8x1xf32> to vector<8x384xf32>
    %8 = arith.addf %5, %7 : vector<8x384xf32>
    %cst = arith.constant 0.000000e+00 : f32
    %9 = vector.broadcast %cst : f32 to vector<8x384xf32>
    %10 = arith.maximumf %8, %9 : vector<8x384xf32>
    %c0_6 = arith.constant 0 : index
    %c0_7 = arith.constant 0 : index
    %c0_8 = arith.constant 0 : index
    %11 = vector.load %arg5[%c0_6, %c0_7, %c0_8] : memref<1x8x384xf32, #tpu.memory_space<vmem>>, vector<1x8x384xf32>
    %12 = vector.shape_cast %11 : vector<1x8x384xf32> to vector<8x384xf32>
    %13 = vector.shape_cast %10 : vector<8x384xf32> to vector<1x8x384xf32>
    tpu.vector_store %arg5[%c0_6, %c0_7, %c0_8], %13 {strides = array<i32>} : memref<1x8x384xf32, #tpu.memory_space<vmem>>, vector<1x8x384xf32>,
    return
  }
  func.func @transform_0(%arg0: i32, %arg1: i32) -> (i32, i32, i32) {
    %c0_i32 = arith.constant 0 : i32
    %c0_i32_0 = arith.constant 0 : i32
    return %arg0, %c0_i32, %arg1 : i32, i32, i32
  }
  func.func @transform_1(%arg0: i32, %arg1: i32) -> (i32, i32) {
    %c0_i32 = arith.constant 0 : i32
    %c0_i32_0 = arith.constant 0 : i32
    %c0_i32_1 = arith.constant 0 : i32
    return %c0_i32, %c0_i32_0 : i32, i32
  }
  func.func @transform_2(%arg0: i32, %arg1: i32) -> (i32, i32) {
    %c0_i32 = arith.constant 0 : i32
    %c0_i32_0 = arith.constant 0 : i32
    %c0_i32_1 = arith.constant 0 : i32
    return %c0_i32, %c0_i32_0 : i32, i32
  }
  func.func @transform_3(%arg0: i32, %arg1: i32) -> (i32, i32, i32) {
    %c0_i32 = arith.constant 0 : i32
    %c0_i32_0 = arith.constant 0 : i32
    return %arg0, %c0_i32, %arg1 : i32, i32, i32
  }
}

</mosaic_0001>

<bundles_post_ra>
// kernel: basic_conv2d.3
= control target key start
LH: loop header
LB: loop body
LE: loop exit
PB: predicated region body
PF: predicated region fallthrough
CT: control target
= control target key end

     0   :  { %s408_s12 = smov 0   ;;  %s410_s13 = smov 0   ;;  %s447_s0 = inlined_call_operand.vmem [shape: bf16[2,8,384], index: 0, kind: input, shape index: {}]   ;;  %s448_s1 = inlined_call_operand.vmem [shape: f32[8,1], index: 1, kind: input, shape index: {}]   ;;  %s449_s2 = inlined_call_operand.vmem [shape: f32[8,1], index: 2, kind: input, shape index: {}]   ;;  %s450_s3 = inlined_call_operand.vmem [shape: f32[2,8,384], index: 3, kind: output, shape index: {}]  }
   0x1   :  { %s412_s14 = smov 0  }
   0x2 LB: > { %s25_s15 = sadd.s32 1, %s381_s13  ;;  %p330_p0 = scmp.ge.s32.totalorder %s385_s14, 1  ;;  %s385_s14 = sphi %s412_s14, %s13_s14   ;;  %s381_s13 = sphi %s410_s13, %s452_s13   ;;  %s377_s12 = sphi %s408_s12, %s451_s12  }
   0x3   : > { %p27_p1 = scmp.ge.s32.totalorder %s25_s15, 2  ;;  %p158_p2 = scmp.lt.s32.totalorder %s385_s14, 3 }
   0x5   : > { %s454_s15 = smov (%p27_p1, %s25_s15), 0  ;;  %p159_p3 = pnand %p330_p0, %p158_p2 }
   0x6   : > { %v215_v0 = vld [vmem:[%s448_s1] sm:$0xff] (!%p159_p3)  ;;  %v387_v1 = vmov (!%p159_p3), 0   ;;  %p191_p4 = scmp.lt.s32.totalorder (!%p159_p3), %s377_s12, 1 }
   0x7   : > { %162 = sbr.rel (%p159_p3) target bundleno = 146 (0x92), region = 32  ;;  %362 = vset.pattern.permute.xlu0 (!%p159_p3), %v387_v1  ;;  %v224_v2 = vld [vmem:[%s449_s2] sm:$0xff] (!%p159_p3) }
   0x8   : > { %218 = vperm.xlu0 (!%p159_p3), %362, %v215_v0  }
   0xc   : > { %227 = vperm.xlu0 (!%p159_p3), %362, %v224_v2  }
   0xe   : > { %s456_s12 = smov (!%p191_p4, %s377_s12), 1 }
   0xf   : > { %s335_s20 = smul.u32 12, %s456_s12 }
  0x10   : > { %s336_s24 = smul.u32 24, %s456_s12 }
  0x11   : > { %s198_s23 = scalar_lea.vmem %s447_s0, %s335_s20 }
  0x12   : > { %v210_v3 = vld [vmem:[%s198_s23] sm:$0xff]  ;;  %v211_v4 = vld [vmem:[%s198_s23 + $0x8] sm:$0xf]  ;;  %s208_s27 = scalar_lea.vmem %s450_s3, %s336_s24 }
  0x13   : > { %v212_v5 = vunpack.c.l.bf16 %v210_v3  ;;  %v213_v6 = vunpack.c.h.bf16 %v210_v3  ;;  %v214_v7 = vunpack.c.l.bf16 %v211_v4 }
  0x87   : > { %v219_v8 = vpop.permute.xlu0 %218 }
  0x88   : > { %v221_v9 = vmul.f32 %v219_v8, %v212_v5  ;;  %v222_v10 = vmul.f32 %v219_v8, %v213_v6  ;;  %v223_v11 = vmul.f32 %v219_v8, %v214_v7 }
  0x8b   : > { %v228_v12 = vpop.permute.xlu0 %227 }
  0x8c   : > { %v230_v13 = vadd.f32 %v228_v12, %v221_v9  ;;  %v231_v14 = vadd.f32 %v228_v12, %v222_v10  ;;  %v232_v15 = vadd.f32 %v228_v12, %v223_v11 }
  0x8e   : > { %v233_v16 = vmax.f32 %v230_v13, 0.0  ;;  %v234_v17 = vmax.f32 %v231_v14, 0.0  ;;  %v235_v18 = vmax.f32 %v232_v15, 0.0 }
  0x90   : > { %236 = vst [vmem:[%s208_s27] sm:$0xff] %v233_v16  ;;  %237 = vst [vmem:[%s208_s27 + $0x8] sm:$0xff] %v234_v17 }
  0x91   : > { %238 = vst [vmem:[%s208_s27 + $0x10] sm:$0xff] %v235_v18 }
  0x92 PF: > { %s13_s14 = sadd.s32 1, %s385_s14   ;;  %s451_s12 = smov %s381_s13 }
  0x93   : > { %p10_p5 = scmp.ge.s32.totalorder %s13_s14, 4   ;;  %s452_s13 = smov %s454_s15 }
  0x95   :  { %12 = sbr.rel (!%p10_p5) target bundleno = 2 (0x2), region = 62 }

// kernel: basic_conv2d.2
= control target key start
LH: loop header
LB: loop body
LE: loop exit
PB: predicated region body
PF: predicated region fallthrough
CT: control target
= control target key end

     0   :  { %s2405_s18 = smov 0   ;;  %s2822_s0 = inlined_call_operand.vmem [shape: bf16[2,4,422], index: 0, kind: input, shape index: {}]   ;;  %s2823_s1 = inlined_call_operand.vmem [shape: bf16[9,8,4], index: 1, kind: input, shape index: {}]   ;;  %s2824_s2 = inlined_call_operand.vmem [shape: f32[384,1], index: 2, kind: input, shape index: {}]   ;;  %s2825_s3 = inlined_call_operand.vmem [shape: bf16[2,8,384], index: 3, kind: output, shape index: {0}]   ;;  %s2826_s4 = inlined_call_operand.vmem [shape: f32[2,8,1], index: 4, kind: output, shape index: {1}]   ;;  %s2827_s5 = inlined_call_operand.vmem [shape: f32[2,8,1], index: 5, kind: output, shape index: {2}]  }
   0x1 LB: > { %s1856_s19 = sadd.s32 4294967295, %s2360_s18   ;;  %p1860_p0 = scmp.ge.s32.totalorder %s2360_s18, 1  ;;  %s2360_s18 = sphi %s2405_s18, %s16_s18  }
   0x2   : > { %p192_p1 = scmp.lt.s32.totalorder %s2360_s18, 3 }
   0x4   : > { %p193_p2 = pnand %p1860_p0, %p192_p1 }
   0x5   : > { %p228_p3 = scmp.lt.s32.totalorder (!%p193_p2), %s1856_s19, 1  ;;  %v257_v0 = vlaneseq (!%p193_p2)  ;;  %v2362_v1 = vmov (!%p193_p2), 1983009808   ;;  %v2363_v5 = vmov (!%p193_p2), 0.0   ;;  %v2364_v6 = vmov (!%p193_p2), 0   ;;  %s2366_s24 = smov (!%p193_p2), 127  }
   0x6   : > { %196 = sbr.rel (%p193_p2) target bundleno = 703 (0x2bf), region = 32  ;;  %v255_v2 = vunpack.c.l.s4 (!%p193_p2), %v2362_v1  ;;  %2030 = vmatprep.subr.bf16.mxu1 (!%p193_p2), %v2363_v5  ;;  %328 = vmatprep.mubr.bf16.mxu0 (!%p193_p2), %v2364_v6  ;;  %vm2365_vm0 = vmmov (!%p193_p2), 0   ;;  %s2367_s25 = smov (!%p193_p2), 126   ;;  %vm278_vm1 = vcmask (!%p193_p2), 1039360   ;;  %vm286_vm2 = vcmask (!%p193_p2), 1041408  }
   0x7   : > { %v258_v3 = vshrl.u32 (!%p193_p2), %v257_v0, 7  ;;  %2032 = vmatprep.mubr.msk.bf16.mxu1 (!%p193_p2), %vm2365_vm0, %v2363_v5  ;;  %s2368_s26 = smov (!%p193_p2), 110   ;;  %s2369_s27 = smov (!%p193_p2), 109   ;;  %v1866_v27 = vld [vmem:[%s2823_s1 + $0x4] sm:$0xf] (!%p193_p2)  ;;  %vm282_vm3 = vcmask (!%p193_p2), 31744  }
   0x8   : > { %v256_v4 = vunpack.c.0.s8 (!%p193_p2), %v255_v2  ;;  %s2370_s28 = smov (!%p193_p2), 108   ;;  %s2371_s29 = smov (!%p193_p2), 92   ;;  %vm516_vm4 = vcmask (!%p193_p2), 1031168   ;;  %vm645_vm5 = vcmask (!%p193_p2), 900096   ;;  %v248_v40 = vld [vmem:[%s2823_s1] sm:$0xf] (!%p193_p2) }
   0x9   : > { %s2372_s30 = smov (!%p193_p2), 91   ;;  %s2373_s6 = smov (!%p193_p2), 90   ;;  %vm774_vm6 = vcmask (!%p193_p2), 891904   ;;  %v1873_v51 = vld [vmem:[%s2823_s1 + $0x8] sm:$0xf] (!%p193_p2)  ;;  %vm903_vm7 = vcmask (!%p193_p2), 883712  }
   0xa   : > { %v259_v7 = vsub.s32 (!%p193_p2), %v256_v4, %v258_v3  ;;  %v1877_v61 = vld [vmem:[%s2823_s1 + $0xc] sm:$0xf] (!%p193_p2)  ;;  %vm1032_vm8 = vcmask (!%p193_p2), 752640   ;;  %vm1161_vm9 = vcmask (!%p193_p2), 744448   ;;  %vm1290_vm10 = vcmask (!%p193_p2), 736256  }
   0xb   : > { %vm1593_vm11 = vcmask (!%p193_p2), 7168  }
   0xd   : > { %s2829_s19 = smov (!%p228_p3, %s1856_s19), 1 }
   0xe   : > { %s2418_s20 = sshll.u32 %s2829_s19, 3  ;;  %s2330_s11 = smul.u32 12, %s2829_s19 }
   0xf   : > { %s232_s23 = scalar_lea.vmem %s2822_s0, %s2418_s20  ;;  %s241_s16 = scalar_lea.vmem %s2826_s4, %s2418_s20 }
  0x10   : > { %v249_v8 = vld [vmem:[%s232_s23] sm:$0xff]  ;;  %s237_s14 = scalar_lea.vmem %s2825_s3, %s2330_s11  ;;  %s245_s22 = scalar_lea.vmem %s2827_s5, %s2418_s20 }
  0x11   : > { %v247_v9 = vld [vmem:[%s232_s23] sm:$0x3f]  ;;  %v260_v10 = vrot.slane %v249_v8, %v259_v7  ;;  %v253_v11 = vcombine.high %v249_v8, %v249_v8 }
  0x12   : > { %v2426_v12 = vrot.slane %v247_v9, %v259_v7  ;;  %v378_v13 = vcombine.high %v247_v9, %v247_v9  ;;  %v1881_v9 = vld [vmem:[%s2823_s1 + $0x10] sm:$0xf] }
  0x13   : > { %270 = vrot.lane.b32.xlu0 %v260_v10, %s2366_s24  ;;  %v268_v14 = vcombine.high %v260_v10, %v260_v10  ;;  %v267_v15 = vrot.slane %v253_v11, %v259_v7 }
  0x14   : > { %v2428_v16 = vrot.slane %v378_v13, %v259_v7  ;;  %v393_v21 = vcombine.high %v2426_v12, %v2426_v12  ;;  %v398_v29 = vsel %vm286_vm2, %v2426_v12, 0 }
  0x15   : > { %274 = vrot.lane.b32.xlu1 %v267_v15, %s2366_s24  ;;  %v269_v17 = vcombine.high %v267_v15, %v267_v15 }
  0x16   : > { %v404_v32 = vsel %vm286_vm2, %v2428_v16, 0 }
  0x17   : > { %272 = vrot.lane.b32.xlu0 %v268_v14, %s2366_s24 }
  0x19   : > { %276 = vrot.lane.b32.xlu1 %v269_v17, %s2366_s24 }
  0x1b   : > { %508 = vrot.lane.b32.xlu0 %v260_v10, %s2367_s25 }
  0x1d   : > { %510 = vrot.lane.b32.xlu1 %v268_v14, %s2367_s25 }
  0x1f   : > { %512 = vrot.lane.b32.xlu0 %v267_v15, %s2367_s25 }
  0x21   : > { %514 = vrot.lane.b32.xlu1 %v269_v17, %s2367_s25 }
  0x23   : > { %637 = vrot.lane.b32.xlu0 %v260_v10, %s2368_s26 }
  0x25   : > { %639 = vrot.lane.b32.xlu1 %v268_v14, %s2368_s26 }
  0x27   : > { %641 = vrot.lane.b32.xlu0 %v267_v15, %s2368_s26 }
  0x29   : > { %643 = vrot.lane.b32.xlu1 %v269_v17, %s2368_s26 }
  0x2b   : > { %766 = vrot.lane.b32.xlu0 %v260_v10, %s2369_s27 }
  0x2d   : > { %768 = vrot.lane.b32.xlu1 %v268_v14, %s2369_s27 }
  0x2f   : > { %770 = vrot.lane.b32.xlu0 %v267_v15, %s2369_s27 }
  0x31   : > { %772 = vrot.lane.b32.xlu1 %v269_v17, %s2369_s27 }
  0x33   : > { %895 = vrot.lane.b32.xlu0 %v260_v10, %s2370_s28 }
  0x35   : > { %897 = vrot.lane.b32.xlu1 %v268_v14, %s2370_s28 }
  0x37   : > { %899 = vrot.lane.b32.xlu0 %v267_v15, %s2370_s28 }
  0x39   : > { %901 = vrot.lane.b32.xlu1 %v269_v17, %s2370_s28 }
  0x3b   : > { %1024 = vrot.lane.b32.xlu0 %v260_v10, %s2371_s29 }
  0x3d   : > { %1026 = vrot.lane.b32.xlu1 %v268_v14, %s2371_s29 }
  0x3f   : > { %1028 = vrot.lane.b32.xlu0 %v267_v15, %s2371_s29 }
  0x41   : > { %1030 = vrot.lane.b32.xlu1 %v269_v17, %s2371_s29 }
  0x43   : > { %1153 = vrot.lane.b32.xlu0 %v260_v10, %s2372_s30 }
  0x45   : > { %1155 = vrot.lane.b32.xlu1 %v268_v14, %s2372_s30 }
  0x47   : > { %1157 = vrot.lane.b32.xlu0 %v267_v15, %s2372_s30 }
  0x49   : > { %1159 = vrot.lane.b32.xlu1 %v269_v17, %s2372_s30 }
  0x4b   : > { %1282 = vrot.lane.b32.xlu0 %v260_v10, %s2373_s6 }
  0x4d   : > { %1284 = vrot.lane.b32.xlu1 %v268_v14, %s2373_s6 }
  0x4f   : > { %1286 = vrot.lane.b32.xlu0 %v267_v15, %s2373_s6 }
  0x51   : > { %1288 = vrot.lane.b32.xlu1 %v269_v17, %s2373_s6 }
  0x85   : > { %v271_v18 = vpop.permute.xlu0 %270 }
  0x87   : > { %v275_v19 = vpop.permute.xlu1 %274 }
  0x89   : > { %v273_v20 = vpop.permute.xlu0 %272 }
  0x8a   : > { %v280_v22 = vsel %vm278_vm1, %v273_v20, %v275_v19  ;;  %v279_v23 = vsel %vm278_vm1, %v271_v18, %v273_v20 }
  0x8b   : > { %1867 = vmatprep.subr.msk.bf16.mxu0 %vm286_vm2, %v280_v22  ;;  %v277_v24 = vpop.permute.xlu1 %276  ;;  %v288_v25 = vsel %vm286_vm2, %v279_v23, 0 }
  0x8c   : > { %297 = vmatpush1.bf16.msra.mxu0 %v288_v25  ;;  %v281_v26 = vsel %vm278_vm1, %v275_v19, %v277_v24  ;;  %v1885_v19 = vld [vmem:[%s2823_s1 + $0x14] sm:$0xf] }
  0x8d   : > { %v294_v28 = vsel %vm286_vm2, %v281_v26, 0  ;;  %1870 = vmatprep.subr.msk.bf16.mxu0 %vm286_vm2, %v393_v21  ;;  %v509_v30 = vpop.permute.xlu0 %508 }
  0x8e   : > { %2031 = vmatpush3.bf16.msra.mxu1 %v294_v28 }
  0x8f   : > { %1868 = vmatmul.mubr.msk.bf16.vlgmr.msra.gmra.mrb[0].mxu0 %vm282_vm3, %v1866_v27  ;;  %2036 = vmatprep.subr.bf16.mxu1 %v2363_v5  ;;  %v511_v31 = vpop.permute.xlu1 %510 }
  0x90   : > { %407 = vmatpush1.bf16.msra.mxu0 %v398_v29  ;;  %438 = vmatprep.mubr.bf16.mxu0 %v2364_v6  ;;  %v517_v37 = vsel %vm516_vm4, %v509_v30, %v511_v31  ;;  %v1889_v29 = vld [vmem:[%s2823_s1 + $0x18] sm:$0xf] }
  0x91   : > { %2033 = vmatmul.mubr.msk.bf16.vlgmr.msra.gmra.mrb[0].mxu1 %vm282_vm3, %v1866_v27  ;;  %v513_v33 = vpop.permute.xlu0 %512  ;;  %v524_v41 = vsel %vm286_vm2, %v517_v37, 0 }
  0x92   : > { %2037 = vmatpush3.bf16.msra.mxu1 %v404_v32  ;;  %v518_v34 = vsel %vm516_vm4, %v511_v31, %v513_v33  ;;  %2038 = vmatprep.mubr.msk.bf16.mxu1 %vm2365_vm0, %v2363_v5 }
  0x93   : > { %v515_v35 = vpop.permute.xlu1 %514  ;;  %1874 = vmatprep.subr.msk.bf16.mxu0 %vm286_vm2, %v518_v34  ;;  %2042 = vmatprep.subr.bf16.mxu1 %v2363_v5 }
  0x94   : > { %v519_v39 = vsel %vm516_vm4, %v513_v33, %v515_v35  ;;  %v1421_v35 = vld [vmem:[%s2824_s2 + $0x80] sm:$0xff] }
  0x95   : > { %v638_v36 = vpop.permute.xlu0 %637  ;;  %v530_v44 = vsel %vm286_vm2, %v519_v39, 0 }
  0x97   : > { %v640_v38 = vpop.permute.xlu1 %639 }
  0x98   : > { %v646_v47 = vsel %vm645_vm5, %v638_v36, %v640_v38  ;;  %v1422_v36 = vld [vmem:[%s2824_s2 + $0x88] sm:$0xff] }
  0x99   : > { %v642_v42 = vpop.permute.xlu0 %641  ;;  %v653_v52 = vsel %vm286_vm2, %v646_v47, 0  ;;  %v1438_v47 = vld [vmem:[%s2824_s2 + $0x108] sm:$0xff] }
  0x9a   : > { %v647_v43 = vsel %vm645_vm5, %v640_v38, %v642_v42  ;;  %v1893_v38 = vld [vmem:[%s2823_s1 + $0x1c] sm:$0xf] }
  0x9b   : > { %1871 = vmatmul.mubr.msk.bf16.vlgmr.msra.gmra.mrb[0].mxu0 %vm282_vm3, %v248_v40  ;;  %v644_v46 = vpop.permute.xlu1 %643 }
  0x9c   : > { %533 = vmatpush1.bf16.msra.mxu0 %v524_v41  ;;  %564 = vmatprep.mubr.bf16.mxu0 %v2364_v6  ;;  %v648_v50 = vsel %vm645_vm5, %v642_v42, %v644_v46  ;;  %v2374_v42 = vmov 0.0|0.0   ;;  %v1437_v46 = vld [vmem:[%s2824_s2 + $0x100] sm:$0xff] }
  0x9d   : > { %2039 = vmatmul.mubr.msk.bf16.vlgmr.msra.gmra.mrb[0].mxu1 %vm282_vm3, %v248_v40  ;;  %1878 = vmatprep.subr.msk.bf16.mxu0 %vm286_vm2, %v647_v43  ;;  %v767_v45 = vpop.permute.xlu0 %766  ;;  %v659_v54 = vsel %vm286_vm2, %v648_v50, 0  ;;  %v2554_v40 = vpack.c.bf16 %v1422_v36, %v1421_v35  ;;  %v1405_v43 = vld [vmem:[%s2824_s2] sm:$0xff]  ;;  %v1418_v35 = vld [vmem:[%s2824_s2 + $0x68] sm:$0xff] }
  0x9e   : > { %2043 = vmatpush3.bf16.msra.mxu1 %v530_v44  ;;  %2044 = vmatprep.mubr.msk.bf16.mxu1 %vm2365_vm0, %v2363_v5  ;;  %v1406_v44 = vld [vmem:[%s2824_s2 + $0x8] sm:$0xff] }
  0x9f   : > { %2048 = vmatprep.subr.bf16.mxu1 %v2363_v5  ;;  %v769_v48 = vpop.permute.xlu1 %768 }
  0xa0   : > { %v775_v57 = vsel %vm774_vm6, %v767_v45, %v769_v48  ;;  %v1424_v45 = vld [vmem:[%s2824_s2 + $0x98] sm:$0xff] }
  0xa1   : > { %v771_v49 = vpop.permute.xlu0 %770  ;;  %v782_v62 = vsel %vm286_vm2, %v775_v57, 0  ;;  %v1440_v57 = vld [vmem:[%s2824_s2 + $0x118] sm:$0xff] }
  0xa2   : > { %v776_v53 = vsel %vm774_vm6, %v769_v48, %v771_v49  ;;  %v1897_v48 = vld [vmem:[%s2823_s1 + $0x20] sm:$0xf] }
  0xa3   : > { %v773_v56 = vpop.permute.xlu1 %772 }
  0xa4   : > { %v777_v60 = vsel %vm774_vm6, %v771_v49, %v773_v56  ;;  %v2585_v49 = vpack.c.bf16 %v1406_v44, %v1405_v43  ;;  %v1439_v56 = vld [vmem:[%s2824_s2 + $0x110] sm:$0xff] }
  0xa5   : > { %v896_v55 = vpop.permute.xlu0 %895  ;;  %v788_v0 = vsel %vm286_vm2, %v777_v60, 0  ;;  %v1409_v60 = vld [vmem:[%s2824_s2 + $0x20] sm:$0xff] }
  0xa7   : > { %1875 = vmatmul.mubr.msk.bf16.vlgmr.msra.gmra.mrb[0].mxu0 %vm282_vm3, %v1873_v51  ;;  %v898_v58 = vpop.permute.xlu1 %897 }
  0xa8   : > { %662 = vmatpush1.bf16.msra.mxu0 %v653_v52  ;;  %693 = vmatprep.mubr.bf16.mxu0 %v2364_v6  ;;  %v904_v3 = vsel %vm903_vm7, %v896_v55, %v898_v58  ;;  %v1408_v52 = vld [vmem:[%s2824_s2 + $0x18] sm:$0xff]  ;;  %v1426_v55 = vld [vmem:[%s2824_s2 + $0xa8] sm:$0xff] }
  0xa9   : > { %2045 = vmatmul.mubr.msk.bf16.vlgmr.msra.gmra.mrb[0].mxu1 %vm282_vm3, %v1873_v51  ;;  %1882 = vmatprep.subr.msk.bf16.mxu0 %vm286_vm2, %v776_v53  ;;  %v900_v59 = vpop.permute.xlu0 %899  ;;  %v911_v10 = vsel %vm286_vm2, %v904_v3, 0  ;;  %v1407_v51 = vld [vmem:[%s2824_s2 + $0x10] sm:$0xff]  ;;  %v2595_v53 = vpack.c.bf16 %v1438_v47, %v1437_v46 }
  0xaa   : > { %2049 = vmatpush3.bf16.msra.mxu1 %v659_v54  ;;  %2050 = vmatprep.mubr.msk.bf16.mxu1 %vm2365_vm0, %v2363_v5  ;;  %v905_v63 = vsel %vm903_vm7, %v898_v58, %v900_v59  ;;  %v1425_v54 = vld [vmem:[%s2824_s2 + $0xa0] sm:$0xff]  ;;  %v2611_v58 = vpack.c.bf16 %v1408_v52, %v1407_v51  ;;  %v1451_v47 = vld [vmem:[%s2824_s2 + $0x170] sm:$0xff] }
  0xab   : > { %2054 = vmatprep.subr.bf16.mxu1 %v2363_v5  ;;  %v902_v2 = vpop.permute.xlu1 %901 }
  0xac   : > { %v906_v8 = vsel %vm903_vm7, %v900_v59, %v902_v2  ;;  %v2615_v59 = vpack.c.bf16 %v1426_v55, %v1425_v54  ;;  %v1442_v2 = vld [vmem:[%s2824_s2 + $0x128] sm:$0xff] }
  0xad   : > { %v1025_v1 = vpop.permute.xlu0 %1024  ;;  %v917_v12 = vsel %vm286_vm2, %v906_v8, 0  ;;  %v1412_v8 = vld [vmem:[%s2824_s2 + $0x38] sm:$0xff] }
  0xaf   : > { %v1027_v4 = vpop.permute.xlu1 %1026 }
  0xb0   : > { %v1033_v15 = vsel %vm1032_vm8, %v1025_v1, %v1027_v4  ;;  %v1441_v1 = vld [vmem:[%s2824_s2 + $0x120] sm:$0xff] }
  0xb1   : > { %v1029_v7 = vpop.permute.xlu0 %1028  ;;  %v1040_v20 = vsel %vm286_vm2, %v1033_v15, 0 }
  0xb2   : > { %v1034_v11 = vsel %vm1032_vm8, %v1027_v4, %v1029_v7 }
  0xb3   : > { %1879 = vmatmul.mubr.msk.bf16.vlgmr.msra.gmra.mrb[0].mxu0 %vm282_vm3, %v1877_v61  ;;  %v1031_v14 = vpop.permute.xlu1 %1030 }
  0xb4   : > { %791 = vmatpush1.bf16.msra.mxu0 %v782_v62  ;;  %822 = vmatprep.mubr.bf16.mxu0 %v2364_v6  ;;  %v1035_v18 = vsel %vm1032_vm8, %v1029_v7, %v1031_v14  ;;  %v2624_v62 = vpack.c.bf16 %v1440_v57, %v1439_v56  ;;  %v1411_v7 = vld [vmem:[%s2824_s2 + $0x30] sm:$0xff] }
  0xb5   : > { %2051 = vmatmul.mubr.msk.bf16.vlgmr.msra.gmra.mrb[0].mxu1 %vm282_vm3, %v1877_v61  ;;  %1886 = vmatprep.subr.msk.bf16.mxu0 %vm286_vm2, %v905_v63  ;;  %v1154_v13 = vpop.permute.xlu0 %1153  ;;  %v1046_v22 = vsel %vm286_vm2, %v1035_v18, 0  ;;  %v1410_v61 = vld [vmem:[%s2824_s2 + $0x28] sm:$0xff]  ;;  %v1427_v63 = vld [vmem:[%s2824_s2 + $0xb0] sm:$0xff]  ;;  %v2670_v14 = vpack.c.bf16 %v1412_v8, %v1411_v7 }
  0xb6   : > { %2055 = vmatpush3.bf16.msra.mxu1 %v788_v0  ;;  %2056 = vmatprep.mubr.msk.bf16.mxu1 %vm2365_vm0, %v2363_v5  ;;  %v1428_v0 = vld [vmem:[%s2824_s2 + $0xb8] sm:$0xff]  ;;  %v2642_v3 = vpack.c.bf16 %v1410_v61, %v1409_v60 }
  0xb7   : > { %2060 = vmatprep.subr.bf16.mxu1 %v2363_v5  ;;  %v1156_v16 = vpop.permute.xlu1 %1155  ;;  %v2645_v4 = vpack.c.bf16 %v1428_v0, %v1427_v63 }
  0xb8   : > { %v1162_v25 = vsel %vm1161_vm9, %v1154_v13, %v1156_v16  ;;  %v1444_v13 = vld [vmem:[%s2824_s2 + $0x138] sm:$0xff] }
  0xb9   : > { %v1158_v17 = vpop.permute.xlu0 %1157  ;;  %v1169_v30 = vsel %vm286_vm2, %v1162_v25, 0  ;;  %v1415_v25 = vld [vmem:[%s2824_s2 + $0x50] sm:$0xff] }
  0xba   : > { %v1163_v21 = vsel %vm1161_vm9, %v1156_v16, %v1158_v17  ;;  %v1413_v16 = vld [vmem:[%s2824_s2 + $0x40] sm:$0xff] }
  0xbb   : > { %v1160_v24 = vpop.permute.xlu1 %1159 }
  0xbc   : > { %v1164_v28 = vsel %vm1161_vm9, %v1158_v17, %v1160_v24  ;;  %v1414_v17 = vld [vmem:[%s2824_s2 + $0x48] sm:$0xff] }
  0xbd   : > { %v1283_v23 = vpop.permute.xlu0 %1282  ;;  %v1175_v32 = vsel %vm286_vm2, %v1164_v28, 0  ;;  %v1433_v28 = vld [vmem:[%s2824_s2 + $0xe0] sm:$0xff] }
  0xbf   : > { %1883 = vmatmul.mubr.msk.bf16.vlgmr.msra.gmra.mrb[0].mxu0 %vm282_vm3, %v1881_v9  ;;  %v1285_v26 = vpop.permute.xlu1 %1284 }
  0xc0   : > { %920 = vmatpush1.bf16.msra.mxu0 %v911_v10  ;;  %951 = vmatprep.mubr.bf16.mxu0 %v2364_v6  ;;  %v1291_v34 = vsel %vm1290_vm10, %v1283_v23, %v1285_v26  ;;  %v1429_v10 = vld [vmem:[%s2824_s2 + $0xc0] sm:$0xff]  ;;  %v2698_v23 = vpack.c.bf16 %v1414_v17, %v1413_v16 }
  0xc1   : > { %2057 = vmatmul.mubr.msk.bf16.vlgmr.msra.gmra.mrb[0].mxu1 %vm282_vm3, %v1881_v9  ;;  %1890 = vmatprep.subr.msk.bf16.mxu0 %vm286_vm2, %v1034_v11  ;;  %v1287_v27 = vpop.permute.xlu0 %1286  ;;  %v1298_v39 = vsel %vm286_vm2, %v1291_v34, 0  ;;  %v2654_v9 = vpack.c.bf16 %v1442_v2, %v1441_v1  ;;  %v1430_v11 = vld [vmem:[%s2824_s2 + $0xc8] sm:$0xff]  ;;  %v1417_v34 = vld [vmem:[%s2824_s2 + $0x60] sm:$0xff] }
  0xc2   : > { %2061 = vmatpush3.bf16.msra.mxu1 %v917_v12  ;;  %2062 = vmatprep.mubr.msk.bf16.mxu1 %vm2365_vm0, %v2363_v5  ;;  %v1292_v31 = vsel %vm1290_vm10, %v1285_v26, %v1287_v27  ;;  %v1443_v12 = vld [vmem:[%s2824_s2 + $0x130] sm:$0xff]  ;;  %v2673_v15 = vpack.c.bf16 %v1430_v11, %v1429_v10  ;;  %v1416_v26 = vld [vmem:[%s2824_s2 + $0x58] sm:$0xff]  ;;  %v2754_v43 = vpack.c.bf16 %v1418_v35, %v1417_v34 }
  0xc3   : > { %2066 = vmatprep.subr.bf16.mxu1 %v2363_v5  ;;  %v1289_v33 = vpop.permute.xlu1 %1288  ;;  %v2682_v18 = vpack.c.bf16 %v1444_v13, %v1443_v12 }
  0xc4   : > { %v1293_v37 = vsel %vm1290_vm10, %v1287_v27, %v1289_v33 }
  0xc5   : > { %v1304_v41 = vsel %vm286_vm2, %v1293_v37, 0  ;;  %v1435_v37 = vld [vmem:[%s2824_s2 + $0xf0] sm:$0xff] }
  0xcb   : > { %1887 = vmatmul.mubr.msk.bf16.vlgmr.msra.gmra.mrb[0].mxu0 %vm282_vm3, %v1885_v19 }
  0xcc   : > { %1049 = vmatpush1.bf16.msra.mxu0 %v1040_v20  ;;  %1080 = vmatprep.mubr.bf16.mxu0 %v2364_v6  ;;  %v1432_v20 = vld [vmem:[%s2824_s2 + $0xd8] sm:$0xff] }
  0xcd   : > { %2063 = vmatmul.mubr.msk.bf16.vlgmr.msra.gmra.mrb[0].mxu1 %vm282_vm3, %v1885_v19  ;;  %1894 = vmatprep.subr.msk.bf16.mxu0 %vm286_vm2, %v1163_v21  ;;  %v1431_v19 = vld [vmem:[%s2824_s2 + $0xd0] sm:$0xff]  ;;  %v1445_v21 = vld [vmem:[%s2824_s2 + $0x140] sm:$0xff] }
  0xce   : > { %2067 = vmatpush3.bf16.msra.mxu1 %v1046_v22  ;;  %2068 = vmatprep.mubr.msk.bf16.mxu1 %vm2365_vm0, %v2363_v5  ;;  %v1446_v22 = vld [vmem:[%s2824_s2 + $0x148] sm:$0xff]  ;;  %v2701_v24 = vpack.c.bf16 %v1432_v20, %v1431_v19 }
  0xcf   : > { %2072 = vmatprep.subr.bf16.mxu1 %v2363_v5  ;;  %v2710_v27 = vpack.c.bf16 %v1446_v22, %v1445_v21 }
  0xd7   : > { %1891 = vmatmul.mubr.msk.bf16.vlgmr.msra.gmra.mrb[0].mxu0 %vm282_vm3, %v1889_v29 }
  0xd8   : > { %1178 = vmatpush1.bf16.msra.mxu0 %v1169_v30  ;;  %1209 = vmatprep.mubr.bf16.mxu0 %v2364_v6  ;;  %v1447_v30 = vld [vmem:[%s2824_s2 + $0x150] sm:$0xff] }
  0xd9   : > { %2069 = vmatmul.mubr.msk.bf16.vlgmr.msra.gmra.mrb[0].mxu1 %vm282_vm3, %v1889_v29  ;;  %1898 = vmatprep.subr.msk.bf16.mxu0 %vm286_vm2, %v1292_v31  ;;  %v1434_v29 = vld [vmem:[%s2824_s2 + $0xe8] sm:$0xff]  ;;  %v1448_v31 = vld [vmem:[%s2824_s2 + $0x158] sm:$0xff] }
  0xda   : > { %2073 = vmatpush3.bf16.msra.mxu1 %v1175_v32  ;;  %2074 = vmatprep.mubr.msk.bf16.mxu1 %vm2365_vm0, %v2363_v5  ;;  %v2726_v32 = vpack.c.bf16 %v1416_v26, %v1415_v25  ;;  %v2729_v33 = vpack.c.bf16 %v1434_v29, %v1433_v28  ;;  %v2738_v36 = vpack.c.bf16 %v1448_v31, %v1447_v30 }
  0xdb   : > { %2078 = vmatprep.subr.bf16.mxu1 %v2363_v5 }
  0xe3   : > { %1895 = vmatmul.mubr.msk.bf16.vlgmr.msra.gmra.mrb[0].mxu0 %vm282_vm3, %v1893_v38 }
  0xe4   : > { %1307 = vmatpush1.bf16.msra.mxu0 %v1298_v39  ;;  %1338 = vmatprep.mubr.bf16.mxu0 %v2364_v6  ;;  %v1423_v6 = vld [vmem:[%s2824_s2 + $0x90] sm:$0xff]  ;;  %v1449_v39 = vld [vmem:[%s2824_s2 + $0x160] sm:$0xff] }
  0xe5   : > { %2075 = vmatmul.mubr.msk.bf16.vlgmr.msra.gmra.mrb[0].mxu1 %vm282_vm3, %v1893_v38  ;;  %2155 = vmatprep.subr.bf16.mxu0 %v2554_v40  ;;  %v2587_v50 = vpack.c.bf16 %v1424_v45, %v1423_v6  ;;  %v1436_v38 = vld [vmem:[%s2824_s2 + $0xf8] sm:$0xff]  ;;  %v1419_v6 = vld [vmem:[%s2824_s2 + $0x70] sm:$0xff] }
  0xe6   : > { %2079 = vmatpush3.bf16.msra.mxu1 %v1304_v41  ;;  %2080 = vmatprep.mubr.msk.bf16.mxu1 %vm2365_vm0, %v2363_v5  ;;  %v1450_v41 = vld [vmem:[%s2824_s2 + $0x168] sm:$0xff]  ;;  %v2757_v44 = vpack.c.bf16 %v1436_v38, %v1435_v37  ;;  %v1420_v45 = vld [vmem:[%s2824_s2 + $0x78] sm:$0xff] }
  0xe7   : > { %2186 = vmatprep.subr.bf16.mxu1 %v2374_v42  ;;  %v2205_v46 = vpack.c.bf16 %v1450_v41, %v1449_v39  ;;  %v2184_v51 = vpack.c.bf16 %v1420_v45, %v1419_v6 }
  0xef   : > { %1899 = vmatmul.mubr.msk.bf16.vlgmr.msra.gmra.mrb[0].mxu0 %vm282_vm3, %v1897_v48 }
  0xf0   : > { %2157 = vmatpush3.bf16.msra.mxu0 %v2585_v49 }
  0xf1   : > { %2081 = vmatmul.mubr.msk.bf16.vlgmr.msra.gmra.mrb[0].mxu1 %vm282_vm3, %v1897_v48  ;;  %2159 = vmatprep.subr.bf16.mxu0 %v2587_v50  ;;  %v1452_v48 = vld [vmem:[%s2824_s2 + $0x178] sm:$0xff] }
  0xf2   : > { %2188 = vmatpush3.bf16.msra.mxu1 %v2595_v53  ;;  %2116 = vmatprep.mubr.msk.f32.mxu1 %vm2365_vm0, %v2363_v5  ;;  %v2208_v52 = vpack.c.bf16 %v1452_v48, %v1451_v47 }
  0xf3   : > { %2189 = vmatprep.subr.bf16.mxu1 %v2374_v42 }
  0xf4   : > { %2161 = vmatpush3.bf16.msra.mxu0 %v2611_v58 }
  0xf5   : > { %2163 = vmatprep.subr.bf16.mxu0 %v2615_v59 }
  0xf6   : > { %2191 = vmatpush3.bf16.msra.mxu1 %v2624_v62 }
  0xf7   : > { %2192 = vmatprep.subr.bf16.mxu1 %v2374_v42 }
  0xf8   : > { %2165 = vmatpush3.bf16.msra.mxu0 %v2642_v3 }
  0xf9   : > { %2167 = vmatprep.subr.bf16.mxu0 %v2645_v4 }
  0xfa   : > { %2194 = vmatpush3.bf16.msra.mxu1 %v2654_v9 }
  0xfb   : > { %2195 = vmatprep.subr.bf16.mxu1 %v2374_v42 }
  0xfc   : > { %2169 = vmatpush3.bf16.msra.mxu0 %v2670_v14 }
  0xfd   : > { %2171 = vmatprep.subr.bf16.mxu0 %v2673_v15 }
  0xfe   : > { %2197 = vmatpush3.bf16.msra.mxu1 %v2682_v18 }
  0xff   : > { %2198 = vmatprep.subr.bf16.mxu1 %v2374_v42 }
 0x100   : > { %2173 = vmatpush3.bf16.msra.mxu0 %v2698_v23 }
 0x101   : > { %2175 = vmatprep.subr.bf16.mxu0 %v2701_v24 }
 0x102   : > { %2200 = vmatpush3.bf16.msra.mxu1 %v2710_v27 }
 0x103   : > { %2201 = vmatprep.subr.bf16.mxu1 %v2374_v42 }
 0x104   : > { %2177 = vmatpush3.bf16.msra.mxu0 %v2726_v32 }
 0x105   : > { %2179 = vmatprep.subr.bf16.mxu0 %v2729_v33 }
 0x106   : > { %2203 = vmatpush3.bf16.msra.mxu1 %v2738_v36 }
 0x107   : > { %2204 = vmatprep.subr.bf16.mxu1 %v2374_v42 }
 0x108   : > { %2181 = vmatpush3.bf16.msra.mxu0 %v2754_v43 }
 0x109   : > { %2183 = vmatprep.subr.bf16.mxu0 %v2757_v44 }
 0x10a   : > { %2206 = vmatpush3.bf16.msra.mxu1 %v2205_v46 }
 0x10b   : > { %2207 = vmatprep.subr.bf16.mxu1 %v2374_v42 }
 0x10c   : > { %2185 = vmatpush3.bf16.msra.mxu0 %v2184_v51 }
 0x10d   : > { %2211 = vmatprep.subr.bf16.mxu0 %v2554_v40 }
 0x10e   : > { %2209 = vmatpush3.bf16.msra.mxu1 %v2208_v52 }
 0x10f   : > { %2242 = vmatprep.subr.bf16.mxu1 %v2374_v42 }
 0x1c2   : > { %v1340_v54 = vpop.f32.mrb[0].mxu0 }
 0x1c3   : > { %v1342_v55 = vpop.f32.mrb[1].mxu0 }
 0x1c4   : > { %v1906_v56 = vpack.c.bf16 %v1342_v55, %v1340_v54  ;;  %v1596_v57 = vmul.f32 %v1342_v55, %v1342_v55  ;;  %v1344_v60 = vpop.f32.mrb[2].mxu0  ;;  %v1381_v61 = vpop.f32.mrb[0].mxu1  ;;  %1517 = vmatprep.mubr.f32.mxu0 %v1342_v55 }
 0x1c5   : > { %v1907_v63 = vpack.c.bf16 %v1381_v61, %v1381_v61  ;;  %v1345_v0 = vpop.f32.mrb[3].mxu0  ;;  %v2082_v1 = vpop.f32.mrb[1].mxu1  ;;  %1518 = vmatmul.mubr.f32.vlgmr.msra.gmra.mrb[4].mxu0 %v1340_v54  ;;  %2117 = vmatmul.mubr.f32.vlgmr.msra.gmra.mrb[4].mxu1 %v1381_v61 }
 0x1c6   : > { %1403 = vst [vmem:[%s237_s14] sm:$0xff] %v1906_v56  ;;  %2213 = vmatpush3.bf16.msra.mxu0 %v2585_v49  ;;  %2244 = vmatpush3.bf16.msra.mxu1 %v2595_v53  ;;  %v1384_v40 = vpop.f32.mrb[2].mxu1  ;;  %v1597_v49 = vmul.f32 %v1381_v61, %v1381_v61 }
 0x1c7   : > { %1404 = vst [vmem:[%s237_s14 + $0x8] sm:$0xf] %v1907_v63  ;;  %1662 = vmatprep.mubr.f32.mxu0 %v1596_v57  ;;  %v2083_v2 = vpop.f32.mrb[3].mxu1  ;;  %2215 = vmatprep.subr.bf16.mxu0 %v2587_v50 }
 0x1c8   : > { %2245 = vmatprep.subr.bf16.mxu1 %v2374_v42  ;;  %2151 = vmatprep.mubr.msk.f32.mxu1 %vm2365_vm0, %v2363_v5  ;;  %v1595_v5 = vmul.f32 %v1340_v54, %v1340_v54 }
 0x1ca   : > { %2217 = vmatpush3.bf16.msra.mxu0 %v2611_v58  ;;  %2247 = vmatpush3.bf16.msra.mxu1 %v2624_v62 }
 0x1cb   : > { %2219 = vmatprep.subr.bf16.mxu0 %v2615_v59  ;;  %2248 = vmatprep.subr.bf16.mxu1 %v2374_v42 }
 0x1ce   : > { %2221 = vmatpush3.bf16.msra.mxu0 %v2642_v3  ;;  %2250 = vmatpush3.bf16.msra.mxu1 %v2654_v9 }
 0x1cf   : > { %2223 = vmatprep.subr.bf16.mxu0 %v2645_v4  ;;  %2251 = vmatprep.subr.bf16.mxu1 %v2374_v42 }
 0x1d2   : > { %2225 = vmatpush3.bf16.msra.mxu0 %v2670_v14  ;;  %2253 = vmatpush3.bf16.msra.mxu1 %v2682_v18 }
 0x1d3   : > { %2227 = vmatprep.subr.bf16.mxu0 %v2673_v15  ;;  %2254 = vmatprep.subr.bf16.mxu1 %v2374_v42 }
 0x1d6   : > { %2229 = vmatpush3.bf16.msra.mxu0 %v2698_v23  ;;  %2256 = vmatpush3.bf16.msra.mxu1 %v2710_v27 }
 0x1d7   : > { %2231 = vmatprep.subr.bf16.mxu0 %v2701_v24  ;;  %2257 = vmatprep.subr.bf16.mxu1 %v2374_v42 }
 0x1da   : > { %2233 = vmatpush3.bf16.msra.mxu0 %v2726_v32  ;;  %2259 = vmatpush3.bf16.msra.mxu1 %v2738_v36 }
 0x1db   : > { %2235 = vmatprep.subr.bf16.mxu0 %v2729_v33  ;;  %2260 = vmatprep.subr.bf16.mxu1 %v2374_v42 }
 0x1de   : > { %2237 = vmatpush3.bf16.msra.mxu0 %v2754_v43  ;;  %2262 = vmatpush3.bf16.msra.mxu1 %v2205_v46 }
 0x1df   : > { %2239 = vmatprep.subr.bf16.mxu0 %v2757_v44  ;;  %2263 = vmatprep.subr.bf16.mxu1 %v2374_v42 }
 0x1e2   : > { %2241 = vmatpush3.bf16.msra.mxu0 %v2184_v51  ;;  %2265 = vmatpush3.bf16.msra.mxu1 %v2208_v52 }
 0x1e5   : > { %1663 = vmatmul.mubr.f32.vlgmr.msra.gmra.mrb[6].mxu0 %v1595_v5  ;;  %2152 = vmatmul.mubr.f32.vlgmr.msra.gmra.mrb[6].mxu1 %v1597_v49 }
 0x298   : > { %v1958_v50 = vpop.f32.mrb[4].mxu0  ;;  %v1589_v53 = vpop.f32.mrb[4].mxu1 }
 0x299   : > { %v1959_v58 = vpop.f32.mrb[5].mxu0  ;;  %v2118_v59 = vpop.f32.mrb[5].mxu1 }
 0x29a   : > { %v1960_v62 = vadd.f32 %v1959_v58, %v1958_v50 }
 0x29c   : > { %v1590_v3 = vadd.f32 %v1960_v62, %v1589_v53 }
 0x29e   : > { %1594 = vst.msk [vmem:[%s241_s16] sm:$0xff] %vm1593_vm11, %v1590_v3 }
 0x2b8   : > { %v2010_v42 = vpop.f32.mrb[6].mxu0  ;;  %v1734_v4 = vpop.f32.mrb[6].mxu1 }
 0x2b9   : > { %v2011_v7 = vpop.f32.mrb[7].mxu0  ;;  %v2153_v8 = vpop.f32.mrb[7].mxu1 }
 0x2ba   : > { %v2012_v9 = vadd.f32 %v2011_v7, %v2010_v42 }
 0x2bc   : > { %v1735_v10 = vadd.f32 %v2012_v9, %v1734_v4 }
 0x2be   : > { %1738 = vst.msk [vmem:[%s245_s22] sm:$0xff] %vm1593_vm11, %v1735_v10 }
 0x2bf PF: > { %s16_s18 = sadd.s32 1, %s2360_s18  }
 0x2c0   : > { %p13_p4 = scmp.ge.s32.totalorder %s16_s18, 4  }
 0x2c2   :  { %15 = sbr.rel (!%p13_p4) target bundleno = 1 (0x1), region = 94 }

</bundles_post_ra>
